<compile_context>
chip_gen: v7x
topology: tpu7x:2x2x1
jax: 0.10.0
libtpu: 0.0.40
codegen_flags: <defaults>
</compile_context>

<pallas_src>
import jax
import jax.numpy as jnp
from jax.experimental import pallas as pl
from jax.experimental.pallas import tpu as pltpu

FEAT_DIM = 2048   # Mixed_7c channel count in inception_v3
PATCH = 4         # stand-in patchify stride (gives 8x8 spatial like Mixed_7c)


def _pool_project_kernel(x_ref, sel_ref, w_ref, b_ref, o_ref):
    """Fused (x*2-1) -> patchify-conv -> global-avg-pool, with the pool hoisted first.

    x_ref:   (TB, C*H*W) f32   flat input samples (read straight from HBM, no im2col)
    sel_ref: (C*H*W, K)  bf16  phase-pooling selector, entries 2/hw (folds x*2 + mean)
    w_ref:   (K, FEAT)   bf16  projection weights (resident across grid steps)
    b_ref:   (1, FEAT)   f32   bias with the "-1" input shift folded in (b - sum_k W[k])
    o_ref:   (TB, FEAT)  f32   pooled features
    """
    x = x_ref[...].astype(jnp.bfloat16)
    # Phase-grouped spatial mean of (2x): one MXU matmul, f32 accumulation.
    pooled = jnp.dot(x, sel_ref[...], preferred_element_type=jnp.float32)      # (TB, K)
    # Projection: (TB, K) @ (K, FEAT) + folded bias.  MXU, f32 accumulation.
    feats = jnp.dot(pooled.astype(jnp.bfloat16), w_ref[...],
                    preferred_element_type=jnp.float32)                        # (TB, FEAT)
    o_ref[...] = feats + b_ref[...]


def _round_up(a, m):
    return ((a + m - 1) // m) * m


def _choose_sample_tile(n):
    """Sample tile: multiple of 8, capped at 128, >= 2 grid steps when possible."""
    n8 = _round_up(max(n, 1), 8)
    if n8 <= 8:
        return 8
    if n8 >= 256:
        return 128
    return _round_up(pl.cdiv(n8, 2), 8)


def partial_inception_forward(x, w, b):
    """x: (N, 3, H, W) float32 in [0,1]  ->  (N, 2048) float32."""
    N, C, H, W = x.shape
    assert C == 3, "Expected input shape to be: (N,3,H,W)"
    assert H % PATCH == 0 and W % PATCH == 0
    h, wd = H // PATCH, W // PATCH
    hw = h * wd
    K = C * PATCH * PATCH
    CHW = C * H * W

    # ---- host-side parameter folding (once, batch independent) ----
    # mean_patches(2x - 1) @ W + b  ==  (x_flat @ Sel*(2/hw)) @ W + (b - sum_k W[k, :])
    r = jnp.arange(H) % PATCH
    col = jnp.arange(W) % PATCH
    c = jnp.arange(C)
    k_of_m = (c[:, None, None] * (PATCH * PATCH)
              + r[None, :, None] * PATCH
              + col[None, None, :]).reshape(CHW)                         # (CHW,)
    sel = (k_of_m[:, None] == jnp.arange(K)[None, :]).astype(jnp.float32)
    sel = (sel * (2.0 / hw)).astype(jnp.bfloat16)                        # (CHW, K)
    w_b16 = w.astype(jnp.bfloat16)                                       # (K, FEAT)
    b_fold = (b - jnp.sum(w, axis=0)).reshape(1, FEAT_DIM).astype(jnp.float32)

    # ---- batch tiling: flat view of x (free, contiguity-preserving reshape) ----
    TB = _choose_sample_tile(N)
    N_pad = _round_up(N, TB)
    x_flat = x.reshape(N, CHW)
    if N_pad != N:
        x_flat = jnp.pad(x_flat, ((0, N_pad - N), (0, 0)))

    out = pl.pallas_call(
        _pool_project_kernel,
        out_shape=jax.ShapeDtypeStruct((N_pad, FEAT_DIM), jnp.float32),
        grid_spec=pltpu.PrefetchScalarGridSpec(
            num_scalar_prefetch=0,
            grid=(pl.cdiv(N_pad, TB),),
            in_specs=[
                pl.BlockSpec((TB, CHW), lambda i: (i, 0)),          # per-step sample tile
                pl.BlockSpec((CHW, K), lambda i: (0, 0)),           # pooling selector, resident
                pl.BlockSpec((K, FEAT_DIM), lambda i: (0, 0)),      # weights, resident
                pl.BlockSpec((1, FEAT_DIM), lambda i: (0, 0)),      # folded bias, resident
            ],
            out_specs=pl.BlockSpec((TB, FEAT_DIM), lambda i: (i, 0)),  # lane/sublane-dense
        ),
        compiler_params=pltpu.CompilerParams(
            dimension_semantics=("parallel",),
            vmem_limit_bytes=32 * 1024 * 1024,
        ),
    )(x_flat, sel, w_b16, b_fold)

    return out[:N]


if __name__ == "__main__":
    key = jax.random.PRNGKey(0)
    kx, kw, kb = jax.random.split(key, 3)

    # Small shapes consistent with the module: NCHW, 3 channels, input in [0,1].
    # (299x299 scaled down to 32x32 for this synthetic run; the stride-4 stand-in
    #  backbone yields 8x8 spatial, matching Mixed_7c.)
    N, C, H, W = 2, 3, 32, 32
    x = jax.random.uniform(kx, (N, C, H, W), dtype=jnp.float32)  # range [0, 1]

    K = C * PATCH * PATCH
    w = jax.random.normal(kw, (K, FEAT_DIM), dtype=jnp.float32) * 0.05
    b = jax.random.normal(kb, (FEAT_DIM,), dtype=jnp.float32) * 0.01

    out = jax.block_until_ready(partial_inception_forward(x, w, b))
    assert out.shape == (N, FEAT_DIM) and out.dtype == jnp.float32

    # Plain-JAX f32 reference with the ORIGINAL (unfolded, un-hoisted) semantics.
    hp, wp = H // PATCH, W // PATCH
    patches = x.reshape(N, C, hp, PATCH, wp, PATCH)
    patches = patches.transpose(0, 2, 4, 1, 3, 5).reshape(N, hp * wp, K)
    ref = ((patches * 2.0 - 1.0) @ w + b).mean(axis=1)

    # Tolerance loosened for bf16 MXU operands (f32 accumulation).
    err = float(jnp.max(jnp.abs(out - ref)))
    assert jnp.allclose(out, ref, atol=1e-2, rtol=1e-2), f"max abs err {err}"

    print("KERNEL_OK")
</pallas_src>

<mosaic_0001>
module attributes {stable_mosaic.version = 11 : i64} {
  func.func @_pool_project_kernel(%arg0: i32, %arg1: memref<8x3072xf32, #tpu.memory_space<vmem>>, %arg2: memref<3072x48xbf16, #tpu.memory_space<vmem>>, %arg3: memref<48x2048xbf16, #tpu.memory_space<vmem>>, %arg4: memref<1x2048xf32, #tpu.memory_space<vmem>>, %arg5: memref<8x2048xf32, #tpu.memory_space<vmem>>) attributes {dimension_semantics = [#tpu.dimension_semantics<parallel>], iteration_bounds = array<i64: 1>, scalar_prefetch = 0 : i64, scratch_operands = 0 : i64, tpu.core_type = #tpu.core_type<tc>, window_params = [{transform_indices = @transform_0, window_bounds = array<i64: 8, 3072>}, {pipeline_mode = #tpu.pipeline_mode<synchronous>, transform_indices = @transform_1, window_bounds = array<i64: 3072, 48>}, {pipeline_mode = #tpu.pipeline_mode<synchronous>, transform_indices = @transform_2, window_bounds = array<i64: 48, 2048>}, {pipeline_mode = #tpu.pipeline_mode<synchronous>, transform_indices = @transform_3, window_bounds = array<i64: 1, 2048>}, {transform_indices = @transform_4, window_bounds = array<i64: 8, 2048>}]} {
    %c0 = arith.constant 0 : index
    %c0_0 = arith.constant 0 : index
    %0 = vector.load %arg1[%c0, %c0_0] : memref<8x3072xf32, #tpu.memory_space<vmem>>, vector<8x3072xf32>
    %1 = arith.truncf %0 : vector<8x3072xf32> to vector<8x3072xbf16>
    %c0_1 = arith.constant 0 : index
    %c0_2 = arith.constant 0 : index
    %2 = vector.load %arg2[%c0_1, %c0_2] : memref<3072x48xbf16, #tpu.memory_space<vmem>>, vector<3072x48xbf16>
    %cst = arith.constant dense<0.000000e+00> : vector<8x48xf32>
    %3 = tpu.matmul %1, %2, %cst {dimension_numbers = #tpu.dot_dimension_numbers<[1], [0], [0], [1], [0, 0, 1, 1], [], []>} : vector<8x3072xbf16>, vector<3072x48xbf16>, vector<8x48xf32> -> vector<8x48xf32>
    %4 = arith.truncf %3 : vector<8x48xf32> to vector<8x48xbf16>
    %c0_3 = arith.constant 0 : index
    %c0_4 = arith.constant 0 : index
    %5 = vector.load %arg3[%c0_3, %c0_4] : memref<48x2048xbf16, #tpu.memory_space<vmem>>, vector<48x2048xbf16>
    %cst_5 = arith.constant dense<0.000000e+00> : vector<8x2048xf32>
    %6 = tpu.matmul %4, %5, %cst_5 {dimension_numbers = #tpu.dot_dimension_numbers<[1], [0], [0], [1], [0, 0, 1, 1], [], []>} : vector<8x48xbf16>, vector<48x2048xbf16>, vector<8x2048xf32> -> vector<8x2048xf32>
    %c0_6 = arith.constant 0 : index
    %c0_7 = arith.constant 0 : index
    %7 = vector.load %arg4[%c0_6, %c0_7] : memref<1x2048xf32, #tpu.memory_space<vmem>>, vector<1x2048xf32>
    %8 = vector.broadcast %7 : vector<1x2048xf32> to vector<8x2048xf32>
    %9 = arith.addf %6, %8 : vector<8x2048xf32>
    %c0_8 = arith.constant 0 : index
    %c0_9 = arith.constant 0 : index
    %10 = vector.load %arg5[%c0_8, %c0_9] : memref<8x2048xf32, #tpu.memory_space<vmem>>, vector<8x2048xf32>
    tpu.vector_store %arg5[%c0_8, %c0_9], %9 {strides = array<i32>} : memref<8x2048xf32, #tpu.memory_space<vmem>>, vector<8x2048xf32>,
    return
  }
  func.func @transform_0(%arg0: i32) -> (i32, i32) {
    %c0_i32 = arith.constant 0 : i32
    %c0_i32_0 = arith.constant 0 : i32
    return %arg0, %c0_i32 : i32, i32
  }
  func.func @transform_1(%arg0: i32) -> (i32, i32) {
    %c0_i32 = arith.constant 0 : i32
    %c0_i32_0 = arith.constant 0 : i32
    %c0_i32_1 = arith.constant 0 : i32
    return %c0_i32, %c0_i32_0 : i32, i32
  }
  func.func @transform_2(%arg0: i32) -> (i32, i32) {
    %c0_i32 = arith.constant 0 : i32
    %c0_i32_0 = arith.constant 0 : i32
    %c0_i32_1 = arith.constant 0 : i32
    return %c0_i32, %c0_i32_0 : i32, i32
  }
  func.func @transform_3(%arg0: i32) -> (i32, i32) {
    %c0_i32 = arith.constant 0 : i32
    %c0_i32_0 = arith.constant 0 : i32
    %c0_i32_1 = arith.constant 0 : i32
    return %c0_i32, %c0_i32_0 : i32, i32
  }
  func.func @transform_4(%arg0: i32) -> (i32, i32) {
    %c0_i32 = arith.constant 0 : i32
    %c0_i32_0 = arith.constant 0 : i32
    return %arg0, %c0_i32 : i32, i32
  }
}

</mosaic_0001>

<bundles_post_ra>
// kernel: tpu_custom_call.1
= control target key start
LH: loop header
LB: loop body
LE: loop exit
PB: predicated region body
PF: predicated region fallthrough
CT: control target
= control target key end

     0   :  { %s4443_s0 = inlined_call_operand.vmem [shape: f32[8,3072], index: 0, kind: input, shape index: {}]   ;;  %s4444_s1 = inlined_call_operand.vmem [shape: bf16[3072,48], index: 1, kind: input, shape index: {}]   ;;  %s4445_s2 = inlined_call_operand.vmem [shape: bf16[48,2048], index: 2, kind: input, shape index: {}]   ;;  %s4446_s3 = inlined_call_operand.vmem [shape: f32[1,2048], index: 3, kind: input, shape index: {}]   ;;  %s4447_s4 = inlined_call_operand.hbm [shape: f32[8,2048], index: 4, kind: output, shape index: {}]  }
   0x1   :  { %v3332_v0 = vld [vmem:[%s4444_s1 + $0x40] sm:$0xff]   ;;  %v3336_v4 = vld [vmem:[%s4444_s1 + $0x48] sm:$0xff]   ;;  %v3340_v8 = vld [vmem:[%s4444_s1 + $0x50] sm:$0xff]  }
   0x2   :  { %v3333_v1 = vld [vmem:[%s4444_s1 + $0xc0] sm:$0xff]   ;;  %3066 = vmatprep.subr.bf16.mxu0 %v3332_v0  ;;  %v3337_v5 = vld [vmem:[%s4444_s1 + $0xc8] sm:$0xff]   ;;  %v3341_v9 = vld [vmem:[%s4444_s1 + $0xd0] sm:$0xff]  }
   0x3   :  { %v3334_v2 = vld [vmem:[%s4444_s1] sm:$0xff]   ;;  %3088 = vmatprep.subr.bf16.mxu1 %v3333_v1  ;;  %v3338_v6 = vld [vmem:[%s4444_s1 + $0x8] sm:$0xff]   ;;  %v3342_v10 = vld [vmem:[%s4444_s1 + $0x10] sm:$0xff]  }
   0x4   :  { %v3335_v3 = vld [vmem:[%s4444_s1 + $0x80] sm:$0xff]   ;;  %3067 = vmatpush3.bf16.msra.mxu0 %v3334_v2  ;;  %v3339_v7 = vld [vmem:[%s4444_s1 + $0x88] sm:$0xff]   ;;  %v3343_v11 = vld [vmem:[%s4444_s1 + $0x90] sm:$0xff]  }
   0x5   :  { %3089 = vmatpush3.bf16.msra.mxu1 %v3335_v3  ;;  %3068 = vmatprep.subr.bf16.mxu0 %v3336_v4  ;;  %v3344_v12 = vld [vmem:[%s4444_s1 + $0x58] sm:$0xff]   ;;  %v3348_v16 = vld [vmem:[%s4444_s1 + $0x60] sm:$0xff]   ;;  %v3352_v20 = vld [vmem:[%s4444_s1 + $0x68] sm:$0xff]  }
   0x6   :  { %3090 = vmatprep.subr.bf16.mxu1 %v3337_v5  ;;  %v3345_v13 = vld [vmem:[%s4444_s1 + $0xd8] sm:$0xff]   ;;  %v3349_v17 = vld [vmem:[%s4444_s1 + $0xe0] sm:$0xff]   ;;  %v3353_v21 = vld [vmem:[%s4444_s1 + $0xe8] sm:$0xff]  }
   0x7   :  { %v3346_v14 = vld [vmem:[%s4444_s1 + $0x18] sm:$0xff]   ;;  %v3350_v18 = vld [vmem:[%s4444_s1 + $0x20] sm:$0xff]   ;;  %v3354_v22 = vld [vmem:[%s4444_s1 + $0x28] sm:$0xff]  }
   0x8   :  { %3069 = vmatpush3.bf16.msra.mxu0 %v3338_v6  ;;  %v3347_v15 = vld [vmem:[%s4444_s1 + $0x98] sm:$0xff]   ;;  %v3351_v19 = vld [vmem:[%s4444_s1 + $0xa0] sm:$0xff]   ;;  %v3355_v23 = vld [vmem:[%s4444_s1 + $0xa8] sm:$0xff]  }
   0x9   :  { %3091 = vmatpush3.bf16.msra.mxu1 %v3339_v7  ;;  %3070 = vmatprep.subr.bf16.mxu0 %v3340_v8  ;;  %v3356_v24 = vld [vmem:[%s4444_s1 + $0x70] sm:$0xff]   ;;  %v3360_v28 = vld [vmem:[%s4444_s1 + $0x78] sm:$0xff]   ;;  %v20_v32 = vld [vmem:[%s4443_s0 + $0x8] sm:$0xff] }
   0xa   :  { %3092 = vmatprep.subr.bf16.mxu1 %v3341_v9  ;;  %v3357_v25 = vld [vmem:[%s4444_s1 + $0xf0] sm:$0xff]   ;;  %v3361_v29 = vld [vmem:[%s4444_s1 + $0xf8] sm:$0xff]   ;;  %v19_v34 = vld [vmem:[%s4443_s0] sm:$0xff]  ;;  %v44_v35 = vpack.c.bf16 %v20_v32, %v20_v32 }
   0xb   :  { %v3358_v26 = vld [vmem:[%s4444_s1 + $0x30] sm:$0xff]   ;;  %v3362_v30 = vld [vmem:[%s4444_s1 + $0x38] sm:$0xff]   ;;  %v43_v37 = vpack.c.bf16 %v19_v34, %v19_v34  ;;  %v3364_v40 = vld [vmem:[%s4444_s1 + $0x140] sm:$0xff]  }
   0xc   :  { %3071 = vmatpush3.bf16.msra.mxu0 %v3342_v10  ;;  %v3359_v27 = vld [vmem:[%s4444_s1 + $0xb0] sm:$0xff]   ;;  %v3363_v31 = vld [vmem:[%s4444_s1 + $0xb8] sm:$0xff]   ;;  %1635 = vmatprep.mubr.bf16.mxu0 %v44_v35  ;;  %v3365_v41 = vld [vmem:[%s4444_s1 + $0x1c0] sm:$0xff]  }
   0xd   :  { %3093 = vmatpush3.bf16.msra.mxu1 %v3343_v11  ;;  %3072 = vmatprep.subr.bf16.mxu0 %v3344_v12  ;;  %v22_v33 = vld [vmem:[%s4443_s0 + $0x18] sm:$0xff]  ;;  %v21_v38 = vld [vmem:[%s4443_s0 + $0x10] sm:$0xff]  ;;  %v3366_v42 = vld [vmem:[%s4444_s1 + $0x100] sm:$0xff]  }
   0xe   :  { %3094 = vmatprep.subr.bf16.mxu1 %v3345_v13  ;;  %v46_v36 = vpack.c.bf16 %v22_v33, %v22_v33  ;;  %v45_v39 = vpack.c.bf16 %v21_v38, %v21_v38  ;;  %v3367_v43 = vld [vmem:[%s4444_s1 + $0x180] sm:$0xff]   ;;  %v3368_v44 = vld [vmem:[%s4444_s1 + $0x148] sm:$0xff]   ;;  %v3372_v48 = vld [vmem:[%s4444_s1 + $0x150] sm:$0xff]  }
   0xf   :  { %v3369_v45 = vld [vmem:[%s4444_s1 + $0x1c8] sm:$0xff]   ;;  %v3373_v49 = vld [vmem:[%s4444_s1 + $0x1d0] sm:$0xff]   ;;  %v3376_v52 = vld [vmem:[%s4444_s1 + $0x158] sm:$0xff]  }
  0x10   :  { %3073 = vmatpush3.bf16.msra.mxu0 %v3346_v14  ;;  %1675 = vmatprep.mubr.bf16.mxu1 %v46_v36  ;;  %v3370_v46 = vld [vmem:[%s4444_s1 + $0x108] sm:$0xff]   ;;  %v3374_v50 = vld [vmem:[%s4444_s1 + $0x110] sm:$0xff]   ;;  %v3377_v53 = vld [vmem:[%s4444_s1 + $0x1d8] sm:$0xff]  }
  0x11   :  { %3095 = vmatpush3.bf16.msra.mxu1 %v3347_v15  ;;  %3074 = vmatprep.subr.bf16.mxu0 %v3348_v16  ;;  %v3371_v47 = vld [vmem:[%s4444_s1 + $0x188] sm:$0xff]   ;;  %v3375_v51 = vld [vmem:[%s4444_s1 + $0x190] sm:$0xff]   ;;  %v3378_v54 = vld [vmem:[%s4444_s1 + $0x118] sm:$0xff]  }
  0x12   :  { %3096 = vmatprep.subr.bf16.mxu1 %v3349_v17  ;;  %v3379_v55 = vld [vmem:[%s4444_s1 + $0x198] sm:$0xff]   ;;  %v3380_v56 = vld [vmem:[%s4444_s1 + $0x160] sm:$0xff]   ;;  %v3384_v60 = vld [vmem:[%s4444_s1 + $0x168] sm:$0xff]  }
  0x13   :  { %v3381_v57 = vld [vmem:[%s4444_s1 + $0x1e0] sm:$0xff]   ;;  %v3385_v61 = vld [vmem:[%s4444_s1 + $0x1e8] sm:$0xff]   ;;  %v3388_v0 = vld [vmem:[%s4444_s1 + $0x170] sm:$0xff]  }
  0x14   :  { %3075 = vmatpush3.bf16.msra.mxu0 %v3350_v18  ;;  %v3382_v58 = vld [vmem:[%s4444_s1 + $0x120] sm:$0xff]   ;;  %v3386_v62 = vld [vmem:[%s4444_s1 + $0x128] sm:$0xff]   ;;  %v3389_v1 = vld [vmem:[%s4444_s1 + $0x1f0] sm:$0xff]  }
  0x15   :  { %3097 = vmatpush3.bf16.msra.mxu1 %v3351_v19  ;;  %3076 = vmatprep.subr.bf16.mxu0 %v3352_v20  ;;  %v3383_v59 = vld [vmem:[%s4444_s1 + $0x1a0] sm:$0xff]   ;;  %v3387_v63 = vld [vmem:[%s4444_s1 + $0x1a8] sm:$0xff]   ;;  %v3390_v2 = vld [vmem:[%s4444_s1 + $0x130] sm:$0xff]  }
  0x16   :  { %3098 = vmatprep.subr.bf16.mxu1 %v3353_v21  ;;  %v3391_v3 = vld [vmem:[%s4444_s1 + $0x1b0] sm:$0xff]   ;;  %v3392_v4 = vld [vmem:[%s4444_s1 + $0x178] sm:$0xff]   ;;  %v24_v8 = vld [vmem:[%s4443_s0 + $0x28] sm:$0xff] }
  0x17   :  { %v3393_v5 = vld [vmem:[%s4444_s1 + $0x1f8] sm:$0xff]   ;;  %v48_v10 = vpack.c.bf16 %v24_v8, %v24_v8  ;;  %v23_v12 = vld [vmem:[%s4443_s0 + $0x20] sm:$0xff]  ;;  %v25_v13 = vld [vmem:[%s4443_s0 + $0x30] sm:$0xff] }
  0x18   :  { %3077 = vmatpush3.bf16.msra.mxu0 %v3354_v22  ;;  %v3394_v6 = vld [vmem:[%s4444_s1 + $0x138] sm:$0xff]   ;;  %v47_v14 = vpack.c.bf16 %v23_v12, %v23_v12  ;;  %v49_v15 = vpack.c.bf16 %v25_v13, %v25_v13  ;;  %v3396_v16 = vld [vmem:[%s4444_s1 + $0x240] sm:$0xff]   ;;  %v3400_v20 = vld [vmem:[%s4444_s1 + $0x248] sm:$0xff]  }
  0x19   :  { %3099 = vmatpush3.bf16.msra.mxu1 %v3355_v23  ;;  %3078 = vmatprep.subr.bf16.mxu0 %v3356_v24  ;;  %v3395_v7 = vld [vmem:[%s4444_s1 + $0x1b8] sm:$0xff]   ;;  %v3397_v17 = vld [vmem:[%s4444_s1 + $0x2c0] sm:$0xff]   ;;  %v3401_v21 = vld [vmem:[%s4444_s1 + $0x2c8] sm:$0xff]  }
  0x1a   :  { %3100 = vmatprep.subr.bf16.mxu1 %v3357_v25  ;;  %v26_v9 = vld [vmem:[%s4443_s0 + $0x38] sm:$0xff]  ;;  %v3398_v18 = vld [vmem:[%s4444_s1 + $0x200] sm:$0xff]   ;;  %v3402_v22 = vld [vmem:[%s4444_s1 + $0x208] sm:$0xff]  }
  0x1b   :  { %v50_v11 = vpack.c.bf16 %v26_v9, %v26_v9  ;;  %v3399_v19 = vld [vmem:[%s4444_s1 + $0x280] sm:$0xff]   ;;  %v3403_v23 = vld [vmem:[%s4444_s1 + $0x288] sm:$0xff]   ;;  %v3404_v24 = vld [vmem:[%s4444_s1 + $0x250] sm:$0xff]  }
  0x1c   :  { %3079 = vmatpush3.bf16.msra.mxu0 %v3358_v26  ;;  %v3405_v25 = vld [vmem:[%s4444_s1 + $0x2d0] sm:$0xff]   ;;  %v3412_v32 = vld [vmem:[%s4444_s1 + $0x260] sm:$0xff]   ;;  %v3416_v36 = vld [vmem:[%s4444_s1 + $0x268] sm:$0xff]  }
  0x1d   :  { %3101 = vmatpush3.bf16.msra.mxu1 %v3359_v27  ;;  %3080 = vmatprep.subr.bf16.mxu0 %v3360_v28  ;;  %v3406_v26 = vld [vmem:[%s4444_s1 + $0x210] sm:$0xff]   ;;  %v3408_v28 = vld [vmem:[%s4444_s1 + $0x258] sm:$0xff]   ;;  %v3413_v33 = vld [vmem:[%s4444_s1 + $0x2e0] sm:$0xff]  }
  0x1e   :  { %3102 = vmatprep.subr.bf16.mxu1 %v3361_v29  ;;  %v3407_v27 = vld [vmem:[%s4444_s1 + $0x290] sm:$0xff]   ;;  %v3409_v29 = vld [vmem:[%s4444_s1 + $0x2d8] sm:$0xff]   ;;  %v3414_v34 = vld [vmem:[%s4444_s1 + $0x220] sm:$0xff]  }
  0x1f   :  { %v3415_v35 = vld [vmem:[%s4444_s1 + $0x2a0] sm:$0xff]   ;;  %v3418_v38 = vld [vmem:[%s4444_s1 + $0x228] sm:$0xff]  }
  0x20   :  { %3081 = vmatpush3.bf16.msra.mxu0 %v3362_v30  ;;  %v3410_v30 = vld [vmem:[%s4444_s1 + $0x218] sm:$0xff]   ;;  %v3444_v8 = vld [vmem:[%s4444_s1 + $0x360] sm:$0xff]   ;;  %v3448_v12 = vld [vmem:[%s4444_s1 + $0x368] sm:$0xff]  }
  0x21   :  { %3103 = vmatpush3.bf16.msra.mxu1 %v3363_v31  ;;  %3110 = vmatprep.subr.bf16.mxu0 %v3364_v40  ;;  %v3411_v31 = vld [vmem:[%s4444_s1 + $0x298] sm:$0xff]   ;;  %v3420_v40 = vld [vmem:[%s4444_s1 + $0x270] sm:$0xff]   ;;  %v3445_v9 = vld [vmem:[%s4444_s1 + $0x3e0] sm:$0xff]  }
  0x22   :  { %3132 = vmatprep.subr.bf16.mxu1 %v3365_v41  ;;  %v3421_v41 = vld [vmem:[%s4444_s1 + $0x2f0] sm:$0xff]   ;;  %v3449_v13 = vld [vmem:[%s4444_s1 + $0x3e8] sm:$0xff]  }
  0x23   :  { %1636 = vmatmul.mubr.bf16.vlgmr.msra.gmra.mrb[0].mxu0 %v43_v37  ;;  %v3417_v37 = vld [vmem:[%s4444_s1 + $0x2e8] sm:$0xff]  }
  0x24   :  { %1676 = vmatmul.mubr.bf16.vlgmr.msra.gmra.mrb[0].mxu1 %v45_v39  ;;  %3111 = vmatpush3.bf16.msra.mxu0 %v3366_v42  ;;  %v3419_v39 = vld [vmem:[%s4444_s1 + $0x2a8] sm:$0xff]   ;;  %v3422_v42 = vld [vmem:[%s4444_s1 + $0x230] sm:$0xff]  }
  0x25   :  { %3133 = vmatpush3.bf16.msra.mxu1 %v3367_v43  ;;  %3112 = vmatprep.subr.bf16.mxu0 %v3368_v44  ;;  %v3423_v43 = vld [vmem:[%s4444_s1 + $0x2b0] sm:$0xff]   ;;  %v3424_v44 = vld [vmem:[%s4444_s1 + $0x278] sm:$0xff]  }
  0x26   :  { %3134 = vmatprep.subr.bf16.mxu1 %v3369_v45  ;;  %1715 = vmatprep.mubr.bf16.mxu0 %v48_v10  ;;  %v3425_v45 = vld [vmem:[%s4444_s1 + $0x2f8] sm:$0xff]   ;;  %v3446_v10 = vld [vmem:[%s4444_s1 + $0x320] sm:$0xff]  }
  0x27   :  { %1755 = vmatprep.mubr.bf16.mxu1 %v50_v11  ;;  %v3447_v11 = vld [vmem:[%s4444_s1 + $0x3a0] sm:$0xff]  }
  0x28   :  { %3113 = vmatpush3.bf16.msra.mxu0 %v3370_v46  ;;  %v3426_v46 = vld [vmem:[%s4444_s1 + $0x238] sm:$0xff]  }
  0x29   :  { %3135 = vmatpush3.bf16.msra.mxu1 %v3371_v47  ;;  %3114 = vmatprep.subr.bf16.mxu0 %v3372_v48  ;;  %v3427_v47 = vld [vmem:[%s4444_s1 + $0x2b8] sm:$0xff]   ;;  %v28_v48 = vld [vmem:[%s4443_s0 + $0x48] sm:$0xff] }
  0x2a   :  { %3136 = vmatprep.subr.bf16.mxu1 %v3373_v49  ;;  %v52_v49 = vpack.c.bf16 %v28_v48, %v28_v48  ;;  %v3476_v48 = vld [vmem:[%s4444_s1 + $0x460] sm:$0xff]  }
  0x2c   :  { %3115 = vmatpush3.bf16.msra.mxu0 %v3374_v50  ;;  %v30_v50 = vld [vmem:[%s4443_s0 + $0x58] sm:$0xff] }
  0x2d   :  { %3137 = vmatpush3.bf16.msra.mxu1 %v3375_v51  ;;  %3116 = vmatprep.subr.bf16.mxu0 %v3376_v52  ;;  %v27_v51 = vld [vmem:[%s4443_s0 + $0x40] sm:$0xff]  ;;  %v29_v52 = vld [vmem:[%s4443_s0 + $0x50] sm:$0xff] }
  0x2e   :  { %3138 = vmatprep.subr.bf16.mxu1 %v3377_v53  ;;  %v54_v53 = vpack.c.bf16 %v30_v50, %v30_v50  ;;  %v3478_v50 = vld [vmem:[%s4444_s1 + $0x420] sm:$0xff]  }
  0x30   :  { %3117 = vmatpush3.bf16.msra.mxu0 %v3378_v54  ;;  %v51_v54 = vpack.c.bf16 %v27_v51, %v27_v51  ;;  %v3479_v51 = vld [vmem:[%s4444_s1 + $0x4a0] sm:$0xff]  }
  0x31   :  { %3139 = vmatpush3.bf16.msra.mxu1 %v3379_v55  ;;  %3118 = vmatprep.subr.bf16.mxu0 %v3380_v56  ;;  %v53_v55 = vpack.c.bf16 %v29_v52, %v29_v52  ;;  %v3428_v56 = vld [vmem:[%s4444_s1 + $0x340] sm:$0xff]   ;;  %v3480_v52 = vld [vmem:[%s4444_s1 + $0x468] sm:$0xff]  }
  0x32   :  { %3140 = vmatprep.subr.bf16.mxu1 %v3381_v57  ;;  %v3429_v57 = vld [vmem:[%s4444_s1 + $0x3c0] sm:$0xff]  }
  0x34   :  { %3119 = vmatpush3.bf16.msra.mxu0 %v3382_v58  ;;  %v3430_v58 = vld [vmem:[%s4444_s1 + $0x300] sm:$0xff]  }
  0x35   :  { %3141 = vmatpush3.bf16.msra.mxu1 %v3383_v59  ;;  %3120 = vmatprep.subr.bf16.mxu0 %v3384_v60  ;;  %v3431_v59 = vld [vmem:[%s4444_s1 + $0x380] sm:$0xff]   ;;  %v3432_v60 = vld [vmem:[%s4444_s1 + $0x348] sm:$0xff]  }
  0x36   :  { %3142 = vmatprep.subr.bf16.mxu1 %v3385_v61  ;;  %v3433_v61 = vld [vmem:[%s4444_s1 + $0x3c8] sm:$0xff]  }
  0x38   :  { %3121 = vmatpush3.bf16.msra.mxu0 %v3386_v62  ;;  %v3434_v62 = vld [vmem:[%s4444_s1 + $0x308] sm:$0xff]  }
  0x39   :  { %3143 = vmatpush3.bf16.msra.mxu1 %v3387_v63  ;;  %3122 = vmatprep.subr.bf16.mxu0 %v3388_v0  ;;  %v3435_v63 = vld [vmem:[%s4444_s1 + $0x388] sm:$0xff]   ;;  %v3436_v0 = vld [vmem:[%s4444_s1 + $0x350] sm:$0xff]  }
  0x3a   :  { %3144 = vmatprep.subr.bf16.mxu1 %v3389_v1  ;;  %v3437_v1 = vld [vmem:[%s4444_s1 + $0x3d0] sm:$0xff]  }
  0x3c   :  { %3123 = vmatpush3.bf16.msra.mxu0 %v3390_v2  ;;  %v3438_v2 = vld [vmem:[%s4444_s1 + $0x310] sm:$0xff]  }
  0x3d   :  { %3145 = vmatpush3.bf16.msra.mxu1 %v3391_v3  ;;  %3124 = vmatprep.subr.bf16.mxu0 %v3392_v4  ;;  %v3439_v3 = vld [vmem:[%s4444_s1 + $0x390] sm:$0xff]   ;;  %v3440_v4 = vld [vmem:[%s4444_s1 + $0x358] sm:$0xff]  }
  0x3e   :  { %3146 = vmatprep.subr.bf16.mxu1 %v3393_v5  ;;  %v3441_v5 = vld [vmem:[%s4444_s1 + $0x3d8] sm:$0xff]  }
  0x40   :  { %3125 = vmatpush3.bf16.msra.mxu0 %v3394_v6  ;;  %v3442_v6 = vld [vmem:[%s4444_s1 + $0x318] sm:$0xff]  }
  0x41   :  { %3147 = vmatpush3.bf16.msra.mxu1 %v3395_v7  ;;  %3154 = vmatprep.subr.bf16.mxu0 %v3396_v16  ;;  %v3443_v7 = vld [vmem:[%s4444_s1 + $0x398] sm:$0xff]   ;;  %v3452_v16 = vld [vmem:[%s4444_s1 + $0x370] sm:$0xff]  }
  0x42   :  { %3176 = vmatprep.subr.bf16.mxu1 %v3397_v17  ;;  %v3453_v17 = vld [vmem:[%s4444_s1 + $0x3f0] sm:$0xff]  }
  0x43   :  { %1716 = vmatmul.mubr.bf16.vlgmr.msra.gmra.mrb[4].mxu0 %v47_v14  ;;  %v3450_v14 = vld [vmem:[%s4444_s1 + $0x328] sm:$0xff]  }
  0x44   :  { %1756 = vmatmul.mubr.bf16.vlgmr.msra.gmra.mrb[4].mxu1 %v49_v15  ;;  %3155 = vmatpush3.bf16.msra.mxu0 %v3398_v18  ;;  %v3451_v15 = vld [vmem:[%s4444_s1 + $0x3a8] sm:$0xff]   ;;  %v3454_v18 = vld [vmem:[%s4444_s1 + $0x330] sm:$0xff]  }
  0x45   :  { %3177 = vmatpush3.bf16.msra.mxu1 %v3399_v19  ;;  %3156 = vmatprep.subr.bf16.mxu0 %v3400_v20  ;;  %v3455_v19 = vld [vmem:[%s4444_s1 + $0x3b0] sm:$0xff]   ;;  %v3456_v20 = vld [vmem:[%s4444_s1 + $0x378] sm:$0xff]  }
  0x46   :  { %3178 = vmatprep.subr.bf16.mxu1 %v3401_v21  ;;  %1795 = vmatprep.mubr.bf16.mxu0 %v52_v49  ;;  %v3457_v21 = vld [vmem:[%s4444_s1 + $0x3f8] sm:$0xff]   ;;  %v3477_v49 = vld [vmem:[%s4444_s1 + $0x4e0] sm:$0xff]  }
  0x47   :  { %1835 = vmatprep.mubr.bf16.mxu1 %v54_v53  ;;  %v3481_v53 = vld [vmem:[%s4444_s1 + $0x4e8] sm:$0xff]  }
  0x48   :  { %3157 = vmatpush3.bf16.msra.mxu0 %v3402_v22  ;;  %v3458_v22 = vld [vmem:[%s4444_s1 + $0x338] sm:$0xff]  }
  0x49   :  { %3179 = vmatpush3.bf16.msra.mxu1 %v3403_v23  ;;  %3158 = vmatprep.subr.bf16.mxu0 %v3404_v24  ;;  %v3459_v23 = vld [vmem:[%s4444_s1 + $0x3b8] sm:$0xff]   ;;  %v32_v24 = vld [vmem:[%s4443_s0 + $0x68] sm:$0xff] }
  0x4a   :  { %3180 = vmatprep.subr.bf16.mxu1 %v3405_v25  ;;  %v34_v25 = vld [vmem:[%s4443_s0 + $0x78] sm:$0xff] }
  0x4c   :  { %3159 = vmatpush3.bf16.msra.mxu0 %v3406_v26  ;;  %v31_v26 = vld [vmem:[%s4443_s0 + $0x60] sm:$0xff] }
  0x4d   :  { %3181 = vmatpush3.bf16.msra.mxu1 %v3407_v27  ;;  %3160 = vmatprep.subr.bf16.mxu0 %v3408_v28  ;;  %v56_v27 = vpack.c.bf16 %v32_v24, %v32_v24  ;;  %v58_v28 = vpack.c.bf16 %v34_v25, %v34_v25  ;;  %v3508_v24 = vld [vmem:[%s4444_s1 + $0x560] sm:$0xff]  }
  0x4e   :  { %3182 = vmatprep.subr.bf16.mxu1 %v3409_v29  ;;  %v55_v29 = vpack.c.bf16 %v31_v26, %v31_v26  ;;  %v3509_v25 = vld [vmem:[%s4444_s1 + $0x5e0] sm:$0xff]  }
  0x4f   :  { %v3510_v26 = vld [vmem:[%s4444_s1 + $0x520] sm:$0xff]  }
  0x50   :  { %3161 = vmatpush3.bf16.msra.mxu0 %v3410_v30  ;;  %v33_v30 = vld [vmem:[%s4443_s0 + $0x70] sm:$0xff] }
  0x51   :  { %3183 = vmatpush3.bf16.msra.mxu1 %v3411_v31  ;;  %3162 = vmatprep.subr.bf16.mxu0 %v3412_v32  ;;  %v57_v31 = vpack.c.bf16 %v33_v30, %v33_v30  ;;  %v3460_v32 = vld [vmem:[%s4444_s1 + $0x440] sm:$0xff]   ;;  %v3514_v30 = vld [vmem:[%s4444_s1 + $0x528] sm:$0xff]  }
  0x52   :  { %3184 = vmatprep.subr.bf16.mxu1 %v3413_v33  ;;  %v3461_v33 = vld [vmem:[%s4444_s1 + $0x4c0] sm:$0xff]  }
  0x54   :  { %3163 = vmatpush3.bf16.msra.mxu0 %v3414_v34  ;;  %v3462_v34 = vld [vmem:[%s4444_s1 + $0x400] sm:$0xff]  }
  0x55   :  { %3185 = vmatpush3.bf16.msra.mxu1 %v3415_v35  ;;  %3164 = vmatprep.subr.bf16.mxu0 %v3416_v36  ;;  %v3463_v35 = vld [vmem:[%s4444_s1 + $0x480] sm:$0xff]   ;;  %v3464_v36 = vld [vmem:[%s4444_s1 + $0x448] sm:$0xff]  }
  0x56   :  { %3186 = vmatprep.subr.bf16.mxu1 %v3417_v37  ;;  %v3465_v37 = vld [vmem:[%s4444_s1 + $0x4c8] sm:$0xff]  }
  0x58   :  { %3165 = vmatpush3.bf16.msra.mxu0 %v3418_v38  ;;  %v3466_v38 = vld [vmem:[%s4444_s1 + $0x408] sm:$0xff]  }
  0x59   :  { %3187 = vmatpush3.bf16.msra.mxu1 %v3419_v39  ;;  %3166 = vmatprep.subr.bf16.mxu0 %v3420_v40  ;;  %v3467_v39 = vld [vmem:[%s4444_s1 + $0x488] sm:$0xff]   ;;  %v3468_v40 = vld [vmem:[%s4444_s1 + $0x450] sm:$0xff]  }
  0x5a   :  { %3188 = vmatprep.subr.bf16.mxu1 %v3421_v41  ;;  %v3469_v41 = vld [vmem:[%s4444_s1 + $0x4d0] sm:$0xff]  }
  0x5c   :  { %3167 = vmatpush3.bf16.msra.mxu0 %v3422_v42  ;;  %v3470_v42 = vld [vmem:[%s4444_s1 + $0x410] sm:$0xff]  }
  0x5d   :  { %3189 = vmatpush3.bf16.msra.mxu1 %v3423_v43  ;;  %3168 = vmatprep.subr.bf16.mxu0 %v3424_v44  ;;  %v3471_v43 = vld [vmem:[%s4444_s1 + $0x490] sm:$0xff]   ;;  %v3472_v44 = vld [vmem:[%s4444_s1 + $0x458] sm:$0xff]  }
  0x5e   :  { %3190 = vmatprep.subr.bf16.mxu1 %v3425_v45  ;;  %v3473_v45 = vld [vmem:[%s4444_s1 + $0x4d8] sm:$0xff]  }
  0x60   :  { %3169 = vmatpush3.bf16.msra.mxu0 %v3426_v46  ;;  %v3474_v46 = vld [vmem:[%s4444_s1 + $0x418] sm:$0xff]  }
  0x61   :  { %3191 = vmatpush3.bf16.msra.mxu1 %v3427_v47  ;;  %3198 = vmatprep.subr.bf16.mxu0 %v3428_v56  ;;  %v3475_v47 = vld [vmem:[%s4444_s1 + $0x498] sm:$0xff]   ;;  %v3484_v56 = vld [vmem:[%s4444_s1 + $0x470] sm:$0xff]  }
  0x62   :  { %3220 = vmatprep.subr.bf16.mxu1 %v3429_v57  ;;  %v3485_v57 = vld [vmem:[%s4444_s1 + $0x4f0] sm:$0xff]  }
  0x63   :  { %1796 = vmatmul.mubr.bf16.vlgmr.msra.gmra.mrb[8].mxu0 %v51_v54  ;;  %v3482_v54 = vld [vmem:[%s4444_s1 + $0x428] sm:$0xff]  }
  0x64   :  { %1836 = vmatmul.mubr.bf16.vlgmr.msra.gmra.mrb[8].mxu1 %v53_v55  ;;  %3199 = vmatpush3.bf16.msra.mxu0 %v3430_v58  ;;  %v3483_v55 = vld [vmem:[%s4444_s1 + $0x4a8] sm:$0xff]   ;;  %v3486_v58 = vld [vmem:[%s4444_s1 + $0x430] sm:$0xff]  }
  0x65   :  { %3221 = vmatpush3.bf16.msra.mxu1 %v3431_v59  ;;  %3200 = vmatprep.subr.bf16.mxu0 %v3432_v60  ;;  %v3487_v59 = vld [vmem:[%s4444_s1 + $0x4b0] sm:$0xff]   ;;  %v3488_v60 = vld [vmem:[%s4444_s1 + $0x478] sm:$0xff]  }
  0x66   :  { %3222 = vmatprep.subr.bf16.mxu1 %v3433_v61  ;;  %1875 = vmatprep.mubr.bf16.mxu0 %v56_v27  ;;  %v3489_v61 = vld [vmem:[%s4444_s1 + $0x4f8] sm:$0xff]   ;;  %v3511_v27 = vld [vmem:[%s4444_s1 + $0x5a0] sm:$0xff]  }
  0x67   :  { %1915 = vmatprep.mubr.bf16.mxu1 %v58_v28  ;;  %v3512_v28 = vld [vmem:[%s4444_s1 + $0x568] sm:$0xff]  }
  0x68   :  { %3201 = vmatpush3.bf16.msra.mxu0 %v3434_v62  ;;  %v3490_v62 = vld [vmem:[%s4444_s1 + $0x438] sm:$0xff]  }
  0x69   :  { %3223 = vmatpush3.bf16.msra.mxu1 %v3435_v63  ;;  %3202 = vmatprep.subr.bf16.mxu0 %v3436_v0  ;;  %v3491_v63 = vld [vmem:[%s4444_s1 + $0x4b8] sm:$0xff]   ;;  %v36_v0 = vld [vmem:[%s4443_s0 + $0x88] sm:$0xff] }
  0x6a   :  { %3224 = vmatprep.subr.bf16.mxu1 %v3437_v1  ;;  %v38_v1 = vld [vmem:[%s4443_s0 + $0x98] sm:$0xff] }
  0x6c   :  { %3203 = vmatpush3.bf16.msra.mxu0 %v3438_v2  ;;  %v60_v2 = vpack.c.bf16 %v36_v0, %v36_v0 }
  0x6d   :  { %3225 = vmatpush3.bf16.msra.mxu1 %v3439_v3  ;;  %3204 = vmatprep.subr.bf16.mxu0 %v3440_v4  ;;  %v62_v3 = vpack.c.bf16 %v38_v1, %v38_v1  ;;  %v35_v4 = vld [vmem:[%s4443_s0 + $0x80] sm:$0xff] }
  0x6e   :  { %3226 = vmatprep.subr.bf16.mxu1 %v3441_v5  ;;  %v37_v5 = vld [vmem:[%s4443_s0 + $0x90] sm:$0xff] }
  0x70   :  { %3205 = vmatpush3.bf16.msra.mxu0 %v3442_v6  ;;  %v59_v6 = vpack.c.bf16 %v35_v4, %v35_v4 }
  0x71   :  { %3227 = vmatpush3.bf16.msra.mxu1 %v3443_v7  ;;  %3206 = vmatprep.subr.bf16.mxu0 %v3444_v8  ;;  %v61_v7 = vpack.c.bf16 %v37_v5, %v37_v5  ;;  %v3492_v8 = vld [vmem:[%s4444_s1 + $0x540] sm:$0xff]  }
  0x72   :  { %3228 = vmatprep.subr.bf16.mxu1 %v3445_v9  ;;  %v3493_v9 = vld [vmem:[%s4444_s1 + $0x5c0] sm:$0xff]  }
  0x74   :  { %3207 = vmatpush3.bf16.msra.mxu0 %v3446_v10  ;;  %v3494_v10 = vld [vmem:[%s4444_s1 + $0x500] sm:$0xff]  }
  0x75   :  { %3229 = vmatpush3.bf16.msra.mxu1 %v3447_v11  ;;  %3208 = vmatprep.subr.bf16.mxu0 %v3448_v12  ;;  %v3495_v11 = vld [vmem:[%s4444_s1 + $0x580] sm:$0xff]   ;;  %v3496_v12 = vld [vmem:[%s4444_s1 + $0x548] sm:$0xff]  }
  0x76   :  { %3230 = vmatprep.subr.bf16.mxu1 %v3449_v13  ;;  %v3497_v13 = vld [vmem:[%s4444_s1 + $0x5c8] sm:$0xff]  }
  0x78   :  { %3209 = vmatpush3.bf16.msra.mxu0 %v3450_v14  ;;  %v3498_v14 = vld [vmem:[%s4444_s1 + $0x508] sm:$0xff]  }
  0x79   :  { %3231 = vmatpush3.bf16.msra.mxu1 %v3451_v15  ;;  %3210 = vmatprep.subr.bf16.mxu0 %v3452_v16  ;;  %v3499_v15 = vld [vmem:[%s4444_s1 + $0x588] sm:$0xff]   ;;  %v3500_v16 = vld [vmem:[%s4444_s1 + $0x550] sm:$0xff]  }
  0x7a   :  { %3232 = vmatprep.subr.bf16.mxu1 %v3453_v17  ;;  %v3501_v17 = vld [vmem:[%s4444_s1 + $0x5d0] sm:$0xff]  }
  0x7c   :  { %3211 = vmatpush3.bf16.msra.mxu0 %v3454_v18  ;;  %v3502_v18 = vld [vmem:[%s4444_s1 + $0x510] sm:$0xff]  }
  0x7d   :  { %3233 = vmatpush3.bf16.msra.mxu1 %v3455_v19  ;;  %3212 = vmatprep.subr.bf16.mxu0 %v3456_v20  ;;  %v3503_v19 = vld [vmem:[%s4444_s1 + $0x590] sm:$0xff]   ;;  %v3504_v20 = vld [vmem:[%s4444_s1 + $0x558] sm:$0xff]  }
  0x7e   :  { %3234 = vmatprep.subr.bf16.mxu1 %v3457_v21  ;;  %v3505_v21 = vld [vmem:[%s4444_s1 + $0x5d8] sm:$0xff]  }
  0x80   :  { %3213 = vmatpush3.bf16.msra.mxu0 %v3458_v22  ;;  %v3506_v22 = vld [vmem:[%s4444_s1 + $0x518] sm:$0xff]  }
  0x81   :  { %3235 = vmatpush3.bf16.msra.mxu1 %v3459_v23  ;;  %3242 = vmatprep.subr.bf16.mxu0 %v3460_v32  ;;  %v3507_v23 = vld [vmem:[%s4444_s1 + $0x598] sm:$0xff]   ;;  %v3516_v32 = vld [vmem:[%s4444_s1 + $0x570] sm:$0xff]  }
  0x82   :  { %3264 = vmatprep.subr.bf16.mxu1 %v3461_v33  ;;  %v3517_v33 = vld [vmem:[%s4444_s1 + $0x5f0] sm:$0xff]  }
  0x83   :  { %1876 = vmatmul.mubr.bf16.vlgmr.msra.gmra.mrb[12].mxu0 %v55_v29  ;;  %v3513_v29 = vld [vmem:[%s4444_s1 + $0x5e8] sm:$0xff]  }
  0x84   :  { %1916 = vmatmul.mubr.bf16.vlgmr.msra.gmra.mrb[12].mxu1 %v57_v31  ;;  %3243 = vmatpush3.bf16.msra.mxu0 %v3462_v34  ;;  %v3515_v31 = vld [vmem:[%s4444_s1 + $0x5a8] sm:$0xff]   ;;  %v3518_v34 = vld [vmem:[%s4444_s1 + $0x530] sm:$0xff]  }
  0x85   :  { %3265 = vmatpush3.bf16.msra.mxu1 %v3463_v35  ;;  %3244 = vmatprep.subr.bf16.mxu0 %v3464_v36  ;;  %v3519_v35 = vld [vmem:[%s4444_s1 + $0x5b0] sm:$0xff]   ;;  %v3520_v36 = vld [vmem:[%s4444_s1 + $0x578] sm:$0xff]  }
  0x86   :  { %3266 = vmatprep.subr.bf16.mxu1 %v3465_v37  ;;  %1955 = vmatprep.mubr.bf16.mxu0 %v60_v2  ;;  %v3521_v37 = vld [vmem:[%s4444_s1 + $0x5f8] sm:$0xff]  }
  0x87   :  { %1995 = vmatprep.mubr.bf16.mxu1 %v62_v3 }
  0x88   :  { %3245 = vmatpush3.bf16.msra.mxu0 %v3466_v38  ;;  %v3522_v38 = vld [vmem:[%s4444_s1 + $0x538] sm:$0xff]  }
  0x89   :  { %3267 = vmatpush3.bf16.msra.mxu1 %v3467_v39  ;;  %3246 = vmatprep.subr.bf16.mxu0 %v3468_v40  ;;  %v3523_v39 = vld [vmem:[%s4444_s1 + $0x5b8] sm:$0xff]   ;;  %v40_v40 = vld [vmem:[%s4443_s0 + $0xa8] sm:$0xff] }
  0x8a   :  { %3268 = vmatprep.subr.bf16.mxu1 %v3469_v41  ;;  %v64_v41 = vpack.c.bf16 %v40_v40, %v40_v40 }
  0x8c   :  { %3247 = vmatpush3.bf16.msra.mxu0 %v3470_v42  ;;  %v42_v42 = vld [vmem:[%s4443_s0 + $0xb8] sm:$0xff] }
  0x8d   :  { %3269 = vmatpush3.bf16.msra.mxu1 %v3471_v43  ;;  %3248 = vmatprep.subr.bf16.mxu0 %v3472_v44  ;;  %v39_v43 = vld [vmem:[%s4443_s0 + $0xa0] sm:$0xff]  ;;  %v41_v44 = vld [vmem:[%s4443_s0 + $0xb0] sm:$0xff] }
  0x8e   :  { %3270 = vmatprep.subr.bf16.mxu1 %v3473_v45  ;;  %v66_v45 = vpack.c.bf16 %v42_v42, %v42_v42 }
  0x90   :  { %3249 = vmatpush3.bf16.msra.mxu0 %v3474_v46  ;;  %v63_v46 = vpack.c.bf16 %v39_v43, %v39_v43 }
  0x91   :  { %3271 = vmatpush3.bf16.msra.mxu1 %v3475_v47  ;;  %3250 = vmatprep.subr.bf16.mxu0 %v3476_v48  ;;  %v65_v47 = vpack.c.bf16 %v41_v44, %v41_v44 }
  0x92   :  { %3272 = vmatprep.subr.bf16.mxu1 %v3477_v49 }
  0x94   :  { %3251 = vmatpush3.bf16.msra.mxu0 %v3478_v50 }
  0x95   :  { %3273 = vmatpush3.bf16.msra.mxu1 %v3479_v51  ;;  %3252 = vmatprep.subr.bf16.mxu0 %v3480_v52 }
  0x96   :  { %3274 = vmatprep.subr.bf16.mxu1 %v3481_v53 }
  0x98   :  { %3253 = vmatpush3.bf16.msra.mxu0 %v3482_v54 }
  0x99   :  { %3275 = vmatpush3.bf16.msra.mxu1 %v3483_v55  ;;  %3254 = vmatprep.subr.bf16.mxu0 %v3484_v56 }
  0x9a   :  { %3276 = vmatprep.subr.bf16.mxu1 %v3485_v57 }
  0x9c   :  { %3255 = vmatpush3.bf16.msra.mxu0 %v3486_v58 }
  0x9d   :  { %3277 = vmatpush3.bf16.msra.mxu1 %v3487_v59  ;;  %3256 = vmatprep.subr.bf16.mxu0 %v3488_v60 }
  0x9e   :  { %3278 = vmatprep.subr.bf16.mxu1 %v3489_v61 }
  0xa0   :  { %3257 = vmatpush3.bf16.msra.mxu0 %v3490_v62 }
  0xa1   :  { %3279 = vmatpush3.bf16.msra.mxu1 %v3491_v63  ;;  %3286 = vmatprep.subr.bf16.mxu0 %v3492_v8 }
  0xa2   :  { %3308 = vmatprep.subr.bf16.mxu1 %v3493_v9 }
  0xa3   :  { %1956 = vmatmul.mubr.bf16.vlgmr.msra.gmra.mrb[16].mxu0 %v59_v6 }
  0xa4   :  { %1996 = vmatmul.mubr.bf16.vlgmr.msra.gmra.mrb[16].mxu1 %v61_v7  ;;  %3287 = vmatpush3.bf16.msra.mxu0 %v3494_v10 }
  0xa5   :  { %3309 = vmatpush3.bf16.msra.mxu1 %v3495_v11  ;;  %3288 = vmatprep.subr.bf16.mxu0 %v3496_v12 }
  0xa6   :  { %3310 = vmatprep.subr.bf16.mxu1 %v3497_v13 }
  0xa8   :  { %3289 = vmatpush3.bf16.msra.mxu0 %v3498_v14 }
  0xa9   :  { %3311 = vmatpush3.bf16.msra.mxu1 %v3499_v15  ;;  %3290 = vmatprep.subr.bf16.mxu0 %v3500_v16 }
  0xaa   :  { %3312 = vmatprep.subr.bf16.mxu1 %v3501_v17 }
  0xac   :  { %3291 = vmatpush3.bf16.msra.mxu0 %v3502_v18 }
  0xad   :  { %3313 = vmatpush3.bf16.msra.mxu1 %v3503_v19  ;;  %3292 = vmatprep.subr.bf16.mxu0 %v3504_v20 }
  0xae   :  { %3314 = vmatprep.subr.bf16.mxu1 %v3505_v21 }
  0xb0   :  { %3293 = vmatpush3.bf16.msra.mxu0 %v3506_v22 }
  0xb1   :  { %3315 = vmatpush3.bf16.msra.mxu1 %v3507_v23  ;;  %3294 = vmatprep.subr.bf16.mxu0 %v3508_v24 }
  0xb2   :  { %3316 = vmatprep.subr.bf16.mxu1 %v3509_v25 }
  0xb4   :  { %3295 = vmatpush3.bf16.msra.mxu0 %v3510_v26 }
  0xb5   :  { %3317 = vmatpush3.bf16.msra.mxu1 %v3511_v27  ;;  %3296 = vmatprep.subr.bf16.mxu0 %v3512_v28 }
  0xb6   :  { %3318 = vmatprep.subr.bf16.mxu1 %v3513_v29 }
  0xb8   :  { %3297 = vmatpush3.bf16.msra.mxu0 %v3514_v30 }
  0xb9   :  { %3319 = vmatpush3.bf16.msra.mxu1 %v3515_v31  ;;  %3298 = vmatprep.subr.bf16.mxu0 %v3516_v32 }
  0xba   :  { %3320 = vmatprep.subr.bf16.mxu1 %v3517_v33 }
  0xbc   :  { %3299 = vmatpush3.bf16.msra.mxu0 %v3518_v34 }
  0xbd   :  { %3321 = vmatpush3.bf16.msra.mxu1 %v3519_v35  ;;  %3300 = vmatprep.subr.bf16.mxu0 %v3520_v36 }
  0xbe   :  { %3322 = vmatprep.subr.bf16.mxu1 %v3521_v37 }
  0xc0   :  { %3301 = vmatpush3.bf16.msra.mxu0 %v3522_v38 }
  0xc1   :  { %3323 = vmatpush3.bf16.msra.mxu1 %v3523_v39 }
  0xc2   :  { %9 = vsyncpa [#allocation3], 0  ;;  %2035 = vmatprep.mubr.bf16.mxu0 %v64_v41  ;;  %2075 = vmatprep.mubr.bf16.mxu1 %v66_v45  ;;  %v2084_v59 = vld [vmem:[%s4445_s2] sm:$0xff]  ;;  %v2085_v61 = vld [vmem:[%s4445_s2 + $0x8] sm:$0xff]  ;;  %v3548_v37 = vmov 0   ;;  %vm2456_vm0 = vcmask 392192  }
  0xc3   :  { %2036 = vmatmul.mubr.bf16.vlgmr.msra.gmra.mrb[20].mxu0 %v63_v46  ;;  %v2092_v60 = vld [vmem:[%s4445_s2 + $0x40] sm:$0xff]  ;;  %v2093_v0 = vld [vmem:[%s4445_s2 + $0x48] sm:$0xff]  ;;  %v4262_v31 = vld [vmem:[%s4445_s2 + $0x10] sm:$0xff] }
  0xc4   :  { %2076 = vmatmul.mubr.bf16.vlgmr.msra.gmra.mrb[20].mxu1 %v65_v47  ;;  %v3010_v62 = vcombine.low %v2084_v59, %v2092_v60  ;;  %v3011_v63 = vcombine.high %v2084_v59, %v2092_v60  ;;  %v3012_v1 = vcombine.low %v2085_v61, %v2093_v0  ;;  %v3013_v2 = vcombine.high %v2085_v61, %v2093_v0  ;;  %v2100_v14 = vld [vmem:[%s4445_s2 + $0x80] sm:$0xff]  ;;  %v2101_v16 = vld [vmem:[%s4445_s2 + $0x88] sm:$0xff]  ;;  %v4267_v32 = vld [vmem:[%s4445_s2 + $0x50] sm:$0xff] }
  0xc5   :  { %v2108_v15 = vld [vmem:[%s4445_s2 + $0xc0] sm:$0xff]  ;;  %v2109_v18 = vld [vmem:[%s4445_s2 + $0xc8] sm:$0xff]  ;;  %v4272_v33 = vld [vmem:[%s4445_s2 + $0x18] sm:$0xff]  ;;  %v3014_v34 = vcombine.low %v4262_v31, %v4267_v32  ;;  %v3015_v35 = vcombine.high %v4262_v31, %v4267_v32  ;;  %2492 = vmatprep.mubr.bf16.mxu0 %v3548_v37  ;;  %2533 = vmatprep.mubr.bf16.mxu1 %v3548_v37 }
  0xc6   :  { %2460 = vmatprep.subr.bf16.mxu0 %v3011_v63  ;;  %2501 = vmatprep.subr.bf16.mxu1 %v3013_v2  ;;  %v3027_v17 = vcombine.high %v2100_v14, %v2108_v15  ;;  %v3026_v20 = vcombine.low %v2100_v14, %v2108_v15  ;;  %v3028_v21 = vcombine.low %v2101_v16, %v2109_v18  ;;  %v2116_v23 = vld [vmem:[%s4445_s2 + $0x100] sm:$0xff]  ;;  %v2117_v25 = vld [vmem:[%s4445_s2 + $0x108] sm:$0xff]  ;;  %v4281_v36 = vld [vmem:[%s4445_s2 + $0x58] sm:$0xff] }
  0xc7   :  { %2461 = vmatpush1.bf16.msra.mxu0 %v3010_v62  ;;  %2502 = vmatpush1.bf16.msra.mxu1 %v3012_v1  ;;  %v3029_v22 = vcombine.high %v2101_v16, %v2109_v18  ;;  %v2124_v24 = vld [vmem:[%s4445_s2 + $0x140] sm:$0xff]  ;;  %v2125_v27 = vld [vmem:[%s4445_s2 + $0x148] sm:$0xff]  ;;  %v3016_v38 = vcombine.low %v4272_v33, %v4281_v36  ;;  %v3017_v39 = vcombine.high %v4272_v33, %v4281_v36 }
  0xc8   :  { %2462 = vmatprep.subr.bf16.mxu0 %v3027_v17  ;;  %v3043_v26 = vcombine.high %v2116_v23, %v2124_v24  ;;  %v3042_v28 = vcombine.low %v2116_v23, %v2124_v24  ;;  %v3044_v29 = vcombine.low %v2117_v25, %v2125_v27  ;;  %v3045_v30 = vcombine.high %v2117_v25, %v2125_v27  ;;  %v2102_v23 = vld [vmem:[%s4445_s2 + $0x90] sm:$0xff]  ;;  %v2103_v25 = vld [vmem:[%s4445_s2 + $0x98] sm:$0xff]  ;;  %v2096_v31 = vld [vmem:[%s4445_s2 + $0x60] sm:$0xff] }
  0xc9   :  { %2503 = vmatprep.subr.bf16.mxu1 %v3029_v22  ;;  %v2110_v24 = vld [vmem:[%s4445_s2 + $0xd0] sm:$0xff]  ;;  %v2089_v32 = vld [vmem:[%s4445_s2 + $0x28] sm:$0xff] }
  0xca   :  { %v2097_v33 = vld [vmem:[%s4445_s2 + $0x68] sm:$0xff] }
  0xcb   :  { %2463 = vmatpush1.bf16.msra.mxu0 %v3026_v20  ;;  %2504 = vmatpush1.bf16.msra.mxu1 %v3028_v21 }
  0xcc   :  { %2464 = vmatprep.subr.bf16.mxu0 %v3043_v26  ;;  %2505 = vmatprep.subr.bf16.mxu1 %v3045_v30  ;;  %v2111_v26 = vld [vmem:[%s4445_s2 + $0xd8] sm:$0xff] }
  0xcd   :  { %v3033_v30 = vcombine.high %v2103_v25, %v2111_v26 }
  0xcf   :  { %2465 = vmatpush1.bf16.msra.mxu0 %v3042_v28  ;;  %2506 = vmatpush1.bf16.msra.mxu1 %v3044_v29  ;;  %v3031_v29 = vcombine.high %v2102_v23, %v2110_v24 }
  0xd0   :  { %2542 = vmatprep.subr.bf16.mxu0 %v3015_v35  ;;  %2583 = vmatprep.subr.bf16.mxu1 %v3017_v39  ;;  %v2118_v35 = vld [vmem:[%s4445_s2 + $0x110] sm:$0xff] }
  0xd1   :  { %v2126_v39 = vld [vmem:[%s4445_s2 + $0x150] sm:$0xff] }
  0xf6   :  { %v3082_v48 = vpop.f32.mrb[0].mxu0 }
  0xf7   :  { %v3104_v49 = vpop.f32.mrb[0].mxu1  ;;  %v3083_v50 = vpop.f32.mrb[1].mxu0 }
  0xf8   :  { %v3105_v51 = vpop.f32.mrb[1].mxu1  ;;  %v3084_v52 = vadd.f32 %v3083_v50, %v3082_v48  ;;  %v3085_v54 = vpop.f32.mrb[2].mxu0 }
  0xf9   :  { %v3106_v53 = vadd.f32 %v3105_v51, %v3104_v49  ;;  %v3107_v55 = vpop.f32.mrb[2].mxu1  ;;  %v3086_v56 = vpop.f32.mrb[3].mxu0 }
  0xfa   :  { %v3108_v57 = vpop.f32.mrb[3].mxu1 }
  0xfb   :  { %v1678_v58 = vadd.f32 %v3106_v53, %v3084_v52 }
 0x116   :  { %v3126_v3 = vpop.f32.mrb[4].mxu0 }
 0x117   :  { %v3148_v4 = vpop.f32.mrb[4].mxu1  ;;  %v3127_v5 = vpop.f32.mrb[5].mxu0 }
 0x118   :  { %v3128_v6 = vadd.f32 %v3127_v5, %v3126_v3  ;;  %v3149_v7 = vpop.f32.mrb[5].mxu1  ;;  %v3129_v8 = vpop.f32.mrb[6].mxu0 }
 0x119   :  { %v3150_v9 = vadd.f32 %v3149_v7, %v3148_v4  ;;  %v3151_v10 = vpop.f32.mrb[6].mxu1  ;;  %v3130_v11 = vpop.f32.mrb[7].mxu0 }
 0x11a   :  { %v1718_v12 = vadd.f32 %v3128_v6, %v1678_v58  ;;  %v3152_v13 = vpop.f32.mrb[7].mxu1 }
 0x11c   :  { %v1758_v19 = vadd.f32 %v3150_v9, %v1718_v12 }
 0x136   :  { %v3170_v40 = vpop.f32.mrb[8].mxu0 }
 0x137   :  { %v3192_v41 = vpop.f32.mrb[8].mxu1  ;;  %v3171_v42 = vpop.f32.mrb[9].mxu0 }
 0x138   :  { %v3172_v43 = vadd.f32 %v3171_v42, %v3170_v40  ;;  %v3193_v44 = vpop.f32.mrb[9].mxu1  ;;  %v3173_v45 = vpop.f32.mrb[10].mxu0  ;;  %v2119_v40 = vld [vmem:[%s4445_s2 + $0x118] sm:$0xff]  ;;  %v3030_v42 = vcombine.low %v2102_v23, %v2110_v24 }
 0x139   :  { %v3194_v46 = vadd.f32 %v3193_v44, %v3192_v41  ;;  %v3195_v47 = vpop.f32.mrb[10].mxu1  ;;  %v3174_v48 = vpop.f32.mrb[11].mxu0  ;;  %v2127_v41 = vld [vmem:[%s4445_s2 + $0x158] sm:$0xff]  ;;  %v3047_v44 = vcombine.high %v2118_v35, %v2126_v39 }
 0x13a   :  { %v1798_v49 = vadd.f32 %v3172_v43, %v1758_v19  ;;  %v3196_v50 = vpop.f32.mrb[11].mxu1  ;;  %v3032_v43 = vcombine.low %v2103_v25, %v2111_v26  ;;  %v3049_v45 = vcombine.high %v2119_v40, %v2127_v41  ;;  %v3048_v36 = vcombine.low %v2119_v40, %v2127_v41  ;;  %v2104_v48 = vld [vmem:[%s4445_s2 + $0xa0] sm:$0xff] }
 0x13b   :  { %v3021_v47 = vcombine.high %v2089_v32, %v2097_v33  ;;  %v2105_v50 = vld [vmem:[%s4445_s2 + $0xa8] sm:$0xff]  ;;  %v2136_v26 = vlaneseq }
 0x13c   :  { %v1838_v51 = vadd.f32 %v3194_v46, %v1798_v49  ;;  %v2088_v46 = vld [vmem:[%s4445_s2 + $0x20] sm:$0xff] }
 0x13d   :  { %v2112_v49 = vld [vmem:[%s4445_s2 + $0xe0] sm:$0xff] }
 0x156   :  { %v3214_v52 = vpop.f32.mrb[12].mxu0 }
 0x157   :  { %v3236_v53 = vpop.f32.mrb[12].mxu1  ;;  %v3215_v54 = vpop.f32.mrb[13].mxu0 }
 0x158   :  { %v3237_v55 = vpop.f32.mrb[13].mxu1  ;;  %v3216_v56 = vadd.f32 %v3215_v54, %v3214_v52  ;;  %v3217_v58 = vpop.f32.mrb[14].mxu0  ;;  %v3018_v52 = vcombine.low %v2088_v46, %v2096_v31  ;;  %v3035_v54 = vcombine.high %v2104_v48, %v2112_v49 }
 0x159   :  { %v3238_v57 = vadd.f32 %v3237_v55, %v3236_v53  ;;  %v3239_v59 = vpop.f32.mrb[14].mxu1  ;;  %v3218_v60 = vpop.f32.mrb[15].mxu0  ;;  %v3020_v53 = vcombine.low %v2089_v32, %v2097_v33  ;;  %v2121_v58 = vld [vmem:[%s4445_s2 + $0x128] sm:$0xff] }
 0x15a   :  { %v3240_v61 = vpop.f32.mrb[15].mxu1  ;;  %v1878_v62 = vadd.f32 %v3216_v56, %v1838_v51  ;;  %v2113_v51 = vld [vmem:[%s4445_s2 + $0xe8] sm:$0xff]  ;;  %v2120_v56 = vld [vmem:[%s4445_s2 + $0x120] sm:$0xff]  ;;  %v3034_v60 = vcombine.low %v2104_v48, %v2112_v49 }
 0x15b   :  { %v3037_v55 = vcombine.high %v2105_v50, %v2113_v51  ;;  %v2129_v59 = vld [vmem:[%s4445_s2 + $0x168] sm:$0xff]  ;;  %v3036_v61 = vcombine.low %v2105_v50, %v2113_v51 }
 0x15c   :  { %v1918_v63 = vadd.f32 %v3238_v57, %v1878_v62  ;;  %v2128_v57 = vld [vmem:[%s4445_s2 + $0x160] sm:$0xff] }
 0x15d   :  { %v3051_v62 = vcombine.high %v2120_v56, %v2128_v57 }
 0x176   :  { %v3258_v0 = vpop.f32.mrb[16].mxu0 }
 0x177   :  { %v3280_v1 = vpop.f32.mrb[16].mxu1  ;;  %v3259_v2 = vpop.f32.mrb[17].mxu0 }
 0x178   :  { %v3260_v3 = vadd.f32 %v3259_v2, %v3258_v0  ;;  %v3281_v4 = vpop.f32.mrb[17].mxu1  ;;  %v3261_v5 = vpop.f32.mrb[18].mxu0  ;;  %v2090_v0 = vld [vmem:[%s4445_s2 + $0x30] sm:$0xff]  ;;  %v2091_v2 = vld [vmem:[%s4445_s2 + $0x38] sm:$0xff] }
 0x179   :  { %v3282_v6 = vadd.f32 %v3281_v4, %v3280_v1  ;;  %v3283_v7 = vpop.f32.mrb[18].mxu1  ;;  %v3262_v8 = vpop.f32.mrb[19].mxu0  ;;  %v2098_v1 = vld [vmem:[%s4445_s2 + $0x70] sm:$0xff]  ;;  %v3050_v4 = vcombine.low %v2120_v56, %v2128_v57  ;;  %v3052_v5 = vcombine.low %v2121_v58, %v2129_v59 }
 0x17a   :  { %v1958_v9 = vadd.f32 %v3260_v3, %v1918_v63  ;;  %v3284_v10 = vpop.f32.mrb[19].mxu1  ;;  %v3053_v63 = vcombine.high %v2121_v58, %v2129_v59  ;;  %v2099_v3 = vld [vmem:[%s4445_s2 + $0x78] sm:$0xff]  ;;  %v2106_v8 = vld [vmem:[%s4445_s2 + $0xb0] sm:$0xff] }
 0x17b   :  { %v3025_v7 = vcombine.high %v2091_v2, %v2099_v3  ;;  %v2107_v10 = vld [vmem:[%s4445_s2 + $0xb8] sm:$0xff] }
 0x17c   :  { %v1998_v11 = vadd.f32 %v3282_v6, %v1958_v9  ;;  %v3023_v6 = vcombine.high %v2090_v0, %v2098_v1  ;;  %v2114_v9 = vld [vmem:[%s4445_s2 + $0xf0] sm:$0xff] }
 0x196   :  { %v3302_v12 = vpop.f32.mrb[20].mxu0 }
 0x197   :  { %v3324_v13 = vpop.f32.mrb[20].mxu1  ;;  %v3303_v14 = vpop.f32.mrb[21].mxu0 }
 0x198   :  { %v3304_v15 = vadd.f32 %v3303_v14, %v3302_v12  ;;  %v3325_v16 = vpop.f32.mrb[21].mxu1  ;;  %v3305_v17 = vpop.f32.mrb[22].mxu0  ;;  %v3022_v12 = vcombine.low %v2090_v0, %v2098_v1  ;;  %v3039_v14 = vcombine.high %v2106_v8, %v2114_v9 }
 0x199   :  { %v3326_v18 = vadd.f32 %v3325_v16, %v3324_v13  ;;  %v3327_v19 = vpop.f32.mrb[22].mxu1  ;;  %v3306_v20 = vpop.f32.mrb[23].mxu0  ;;  %v3024_v13 = vcombine.low %v2091_v2, %v2099_v3  ;;  %v2122_v16 = vld [vmem:[%s4445_s2 + $0x130] sm:$0xff] }
 0x19a   :  { %v2038_v21 = vadd.f32 %v3304_v15, %v1998_v11  ;;  %v3328_v22 = vpop.f32.mrb[23].mxu1  ;;  %v2115_v11 = vld [vmem:[%s4445_s2 + $0xf8] sm:$0xff]  ;;  %v2130_v17 = vld [vmem:[%s4445_s2 + $0x170] sm:$0xff]  ;;  %v3038_v20 = vcombine.low %v2106_v8, %v2114_v9 }
 0x19b   :  { %v3041_v15 = vcombine.high %v2107_v10, %v2115_v11  ;;  %v2131_v19 = vld [vmem:[%s4445_s2 + $0x178] sm:$0xff]  ;;  %v3055_v22 = vcombine.high %v2122_v16, %v2130_v17  ;;  %v3054_v24 = vcombine.low %v2122_v16, %v2130_v17 }
 0x19c   :  { %v2078_v27 = vadd.f32 %v3326_v18, %v2038_v21  ;;  %v2123_v18 = vld [vmem:[%s4445_s2 + $0x138] sm:$0xff]  ;;  %v3040_v21 = vcombine.low %v2107_v10, %v2115_v11 }
 0x19d   :  { %v3057_v23 = vcombine.high %v2123_v18, %v2131_v19  ;;  %v3056_v25 = vcombine.low %v2123_v18, %v2131_v19 }
 0x19e   :  { %v4301_v28 = vpack.c.bf16 %v2078_v27, %v2078_v27  ;;  %v4415_v27 = vshrl.u32 %v2136_v26, 7 }
 0x1a0   :  { %3058 = vmatmul.mubr.msk.bf16.vlgmr.msra.gmra.mrb[24].mxu0 %vm2456_vm0, %v4301_v28  ;;  %3059 = vmatmul.mubr.msk.bf16.vlgmr.msra.gmra.mrb[24].mxu1 %vm2456_vm0, %v4301_v28  ;;  %v2154_v49 = vsub.s32 4, %v4415_v27  ;;  %v2162_v50 = vsub.s32 6, %v4415_v27  ;;  %v2158_v51 = vsub.s32 5, %v4415_v27 }
 0x1a1   :  { %2543 = vmatpush1.bf16.msra.mxu0 %v3014_v34  ;;  %2584 = vmatpush1.bf16.msra.mxu1 %v3016_v38  ;;  %v3046_v34 = vcombine.low %v2118_v35, %v2126_v39  ;;  %v3019_v38 = vcombine.high %v2088_v46, %v2096_v31  ;;  %v2142_v35 = vsub.s32 1, %v4415_v27  ;;  %v2150_v39 = vsub.s32 3, %v4415_v27 }
 0x1a2   :  { %2544 = vmatprep.subr.bf16.mxu0 %v3031_v29  ;;  %2585 = vmatprep.subr.bf16.mxu1 %v3033_v30  ;;  %v2138_v29 = vsub.s32 0, %v4415_v27  ;;  %v2132_v30 = vld [vmem:[%s4446_s3] sm:$0xff] }
 0x1a3   :  { %2574 = vmatprep.mubr.bf16.mxu0 %v3548_v37  ;;  %2615 = vmatprep.mubr.bf16.mxu1 %v3548_v37 }
 0x1a4   :  { %v2139_v40 = vrot.slane %v2132_v30, %v2138_v29 }
 0x1a5   :  { %2545 = vmatpush1.bf16.msra.mxu0 %v3030_v42  ;;  %2586 = vmatpush1.bf16.msra.mxu1 %v3032_v43  ;;  %v2143_v42 = vrot.slane %v2132_v30, %v2142_v35  ;;  %v2151_v43 = vrot.slane %v2132_v30, %v2150_v39 }
 0x1a6   :  { %2546 = vmatprep.subr.bf16.mxu0 %v3047_v44  ;;  %2587 = vmatprep.subr.bf16.mxu1 %v3049_v45 }
 0x1a9   :  { %2547 = vmatpush1.bf16.msra.mxu0 %v3046_v34  ;;  %2588 = vmatpush1.bf16.msra.mxu1 %v3048_v36 }
 0x1aa   :  { %2624 = vmatprep.subr.bf16.mxu0 %v3019_v38  ;;  %2665 = vmatprep.subr.bf16.mxu1 %v3021_v47 }
 0x1ac   :  { %3060 = vmatmul.mubr.msk.bf16.vlgmr.msra.gmra.mrb[28].mxu0 %vm2456_vm0, %v4301_v28  ;;  %3061 = vmatmul.mubr.msk.bf16.vlgmr.msra.gmra.mrb[28].mxu1 %vm2456_vm0, %v4301_v28 }
 0x1ad   :  { %2625 = vmatpush1.bf16.msra.mxu0 %v3018_v52  ;;  %2666 = vmatpush1.bf16.msra.mxu1 %v3020_v53  ;;  %v2166_v52 = vsub.s32 7, %v4415_v27  ;;  %v2155_v53 = vrot.slane %v2132_v30, %v2154_v49 }
 0x1ae   :  { %2626 = vmatprep.subr.bf16.mxu0 %v3035_v54  ;;  %2667 = vmatprep.subr.bf16.mxu1 %v3037_v55  ;;  %v2163_v54 = vrot.slane %v2132_v30, %v2162_v50  ;;  %v2159_v55 = vrot.slane %v2132_v30, %v2158_v51 }
 0x1af   :  { %2656 = vmatprep.mubr.bf16.mxu0 %v3548_v37  ;;  %2697 = vmatprep.mubr.bf16.mxu1 %v3548_v37  ;;  %v2167_v56 = vrot.slane %v2132_v30, %v2166_v52 }
 0x1b1   :  { %2627 = vmatpush1.bf16.msra.mxu0 %v3034_v60  ;;  %2668 = vmatpush1.bf16.msra.mxu1 %v3036_v61 }
 0x1b2   :  { %2628 = vmatprep.subr.bf16.mxu0 %v3051_v62  ;;  %2669 = vmatprep.subr.bf16.mxu1 %v3053_v63 }
 0x1b5   :  { %2629 = vmatpush1.bf16.msra.mxu0 %v3050_v4  ;;  %2670 = vmatpush1.bf16.msra.mxu1 %v3052_v5  ;;  %v2133_v5 = vld [vmem:[%s4446_s3 + $0x8] sm:$0xff]  ;;  %s3549_s3 = smov [#allocation2]  }
 0x1b6   :  { %2706 = vmatprep.subr.bf16.mxu0 %v3023_v6  ;;  %2747 = vmatprep.subr.bf16.mxu1 %v3025_v7  ;;  %v2171_v6 = vrot.slane %v2133_v5, %v2138_v29  ;;  %v2175_v8 = vrot.slane %v2133_v5, %v2142_v35  ;;  %v2183_v9 = vrot.slane %v2133_v5, %v2150_v39  ;;  %s2810_s18 = sshll.u32 %s3549_s3, 4  ;;  %s2811_s18 = int_to_ptr.vmem [resolvable:$true] %s2810_s18 }
 0x1b7   :  { %s3524_s19 = scalar_lea.vmem %s2811_s18, 2048  ;;  %p3529_p1 = scmp.lt.s32.totalorder %s2811_s18, %s2811_s18 }
 0x1b8   :  { %3062 = vmatmul.mubr.msk.bf16.vlgmr.msra.gmra.mrb[32].mxu0 %vm2456_vm0, %v4301_v28  ;;  %3063 = vmatmul.mubr.msk.bf16.vlgmr.msra.gmra.mrb[32].mxu1 %vm2456_vm0, %v4301_v28  ;;  %p3525_p0 = scmp.ne.s32.totalorder %s2811_s18, %s3524_s19  ;;  %p3530_p2 = scmp.lt.s32.totalorder %s3524_s19, %s3524_s19 }
 0x1b9   :  { %2707 = vmatpush1.bf16.msra.mxu0 %v3022_v12  ;;  %2748 = vmatpush1.bf16.msra.mxu1 %v3024_v13 }
 0x1ba   :  { %2708 = vmatprep.subr.bf16.mxu0 %v3039_v14  ;;  %2749 = vmatprep.subr.bf16.mxu1 %v3041_v15  ;;  %p3531_p3 = por %p3530_p2, %p3529_p1 }
 0x1bb   :  { %2738 = vmatprep.mubr.bf16.mxu0 %v3548_v37  ;;  %2779 = vmatprep.mubr.bf16.mxu1 %v3548_v37  ;;  %v2146_v37 = vsub.s32 2, %v4415_v27 }
 0x1bc   :  { %p3532_p4 = pnand %p3531_p3, %p3525_p0 }
 0x1bd   :  { %2709 = vmatpush1.bf16.msra.mxu0 %v3038_v20  ;;  %2750 = vmatpush1.bf16.msra.mxu1 %v3040_v21  ;;  %v2147_v41 = vrot.slane %v2132_v30, %v2146_v37  ;;  %v2179_v7 = vrot.slane %v2133_v5, %v2146_v37 }
 0x1be   :  { %2710 = vmatprep.subr.bf16.mxu0 %v3055_v22  ;;  %2751 = vmatprep.subr.bf16.mxu1 %v3057_v23  ;;  %v2187_v22 = vrot.slane %v2133_v5, %v2154_v49  ;;  %v2195_v23 = vrot.slane %v2133_v5, %v2162_v50 }
 0x1c1   :  { %2711 = vmatpush1.bf16.msra.mxu0 %v3054_v24  ;;  %2752 = vmatpush1.bf16.msra.mxu1 %v3056_v25  ;;  %v2191_v24 = vrot.slane %v2133_v5, %v2158_v51  ;;  %v2199_v25 = vrot.slane %v2133_v5, %v2166_v52 }
 0x1c4   :  { %3064 = vmatmul.mubr.msk.bf16.vlgmr.msra.gmra.mrb[36].mxu0 %vm2456_vm0, %v4301_v28  ;;  %3065 = vmatmul.mubr.msk.bf16.vlgmr.msra.gmra.mrb[36].mxu1 %vm2456_vm0, %v4301_v28 }
 0x273   :  { %v2494_v28 = vpop.f32.mrb[24].mxu0  ;;  %v2535_v44 = vpop.f32.mrb[24].mxu1 }
 0x274   :  { %v2495_v45 = vadd.f32 %v2494_v28, %v2139_v40  ;;  %v2536_v46 = vadd.f32 %v2535_v44, %v2147_v41  ;;  %v2496_v31 = vpop.f32.mrb[25].mxu0  ;;  %v2537_v32 = vpop.f32.mrb[25].mxu1 }
 0x275   :  { %v2497_v33 = vadd.f32 %v2496_v31, %v2143_v42  ;;  %v2538_v34 = vadd.f32 %v2537_v32, %v2151_v43  ;;  %v2498_v36 = vpop.f32.mrb[26].mxu0  ;;  %v2539_v38 = vpop.f32.mrb[26].mxu1 }
 0x276   :  { %2788 = vst [vmem:[#allocation2] sm:$0xff] %v2495_v45  ;;  %2790 = vst [vmem:[#allocation2 + $0x10] sm:$0xff] %v2536_v46  ;;  %v2499_v47 = vpop.f32.mrb[27].mxu0  ;;  %v2540_v48 = vpop.f32.mrb[27].mxu1 }
 0x277   :  { %2789 = vst [vmem:[#allocation2 + $0x8] sm:$0xff] %v2497_v33  ;;  %2791 = vst [vmem:[#allocation2 + $0x18] sm:$0xff] %v2538_v34 }
 0x27f   :  { %v2576_v57 = vpop.f32.mrb[28].mxu0  ;;  %v2617_v58 = vpop.f32.mrb[28].mxu1 }
 0x280   :  { %v2577_v59 = vadd.f32 %v2576_v57, %v2155_v53  ;;  %v2618_v60 = vadd.f32 %v2617_v58, %v2163_v54  ;;  %v2578_v61 = vpop.f32.mrb[29].mxu0  ;;  %v2619_v62 = vpop.f32.mrb[29].mxu1 }
 0x281   :  { %v2579_v63 = vadd.f32 %v2578_v61, %v2159_v55  ;;  %v2620_v0 = vadd.f32 %v2619_v62, %v2167_v56  ;;  %v2580_v1 = vpop.f32.mrb[30].mxu0  ;;  %v2621_v2 = vpop.f32.mrb[30].mxu1 }
 0x282   :  { %2792 = vst [vmem:[#allocation2 + $0x20] sm:$0xff] %v2577_v59  ;;  %2794 = vst [vmem:[#allocation2 + $0x30] sm:$0xff] %v2618_v60  ;;  %v2581_v3 = vpop.f32.mrb[31].mxu0  ;;  %v2622_v4 = vpop.f32.mrb[31].mxu1 }
 0x283   :  { %2793 = vst [vmem:[#allocation2 + $0x28] sm:$0xff] %v2579_v63  ;;  %2795 = vst [vmem:[#allocation2 + $0x38] sm:$0xff] %v2620_v0 }
 0x28b   :  { %v2658_v10 = vpop.f32.mrb[32].mxu0  ;;  %v2699_v11 = vpop.f32.mrb[32].mxu1 }
 0x28c   :  { %v2659_v12 = vadd.f32 %v2658_v10, %v2171_v6  ;;  %v2700_v13 = vadd.f32 %v2699_v11, %v2179_v7  ;;  %v2660_v14 = vpop.f32.mrb[33].mxu0  ;;  %v2701_v15 = vpop.f32.mrb[33].mxu1 }
 0x28d   :  { %v2661_v16 = vadd.f32 %v2660_v14, %v2175_v8  ;;  %v2702_v17 = vadd.f32 %v2701_v15, %v2183_v9  ;;  %v2662_v18 = vpop.f32.mrb[34].mxu0  ;;  %v2703_v19 = vpop.f32.mrb[34].mxu1 }
 0x28e   :  { %2796 = vst [vmem:[#allocation2 + $0x40] sm:$0xff] %v2659_v12  ;;  %2798 = vst [vmem:[#allocation2 + $0x50] sm:$0xff] %v2700_v13  ;;  %v2663_v20 = vpop.f32.mrb[35].mxu0  ;;  %v2704_v21 = vpop.f32.mrb[35].mxu1 }
 0x28f   :  { %2797 = vst [vmem:[#allocation2 + $0x48] sm:$0xff] %v2661_v16  ;;  %2799 = vst [vmem:[#allocation2 + $0x58] sm:$0xff] %v2702_v17 }
 0x297   :  { %v2740_v26 = vpop.f32.mrb[36].mxu0  ;;  %v2781_v27 = vpop.f32.mrb[36].mxu1 }
 0x298   :  { %v2741_v29 = vadd.f32 %v2740_v26, %v2187_v22  ;;  %v2782_v37 = vadd.f32 %v2781_v27, %v2195_v23  ;;  %v2742_v30 = vpop.f32.mrb[37].mxu0  ;;  %v2783_v35 = vpop.f32.mrb[37].mxu1 }
 0x299   :  { %v2743_v39 = vadd.f32 %v2742_v30, %v2191_v24  ;;  %v2784_v40 = vadd.f32 %v2783_v35, %v2199_v25  ;;  %v2744_v41 = vpop.f32.mrb[38].mxu0  ;;  %v2785_v42 = vpop.f32.mrb[38].mxu1 }
 0x29a   :  { %2800 = vst [vmem:[#allocation2 + $0x60] sm:$0xff] %v2741_v29  ;;  %2802 = vst [vmem:[#allocation2 + $0x70] sm:$0xff] %v2782_v37  ;;  %v2745_v43 = vpop.f32.mrb[39].mxu0  ;;  %v2786_v28 = vpop.f32.mrb[39].mxu1 }
 0x29b   :  { %2801 = vst [vmem:[#allocation2 + $0x68] sm:$0xff] %v2743_v39  ;;  %2803 = vst [vmem:[#allocation2 + $0x78] sm:$0xff] %v2784_v40 }
 0x29c   :  { %3535 = shalt.err (!%p3532_p4)
}
 0x29d   :  { %s3536_s22 = scalar_lea.hbm %s4447_s4, 2048 }
 0x29e   :  { %p3537_p5 = scmp.ne.s32.totalorder %s4447_s4, %s3536_s22  ;;  %p3540_p6 = scmp.lt.u32.totalorder %s3536_s22, %s4447_s4 }
 0x2a0   :  { %p3542_p7 = pnand %p3540_p6, %p3537_p5 }
 0x2a2   :  { %3545 = shalt.err (!%p3542_p7)
}
 0x2a3   :  { %2813 = dma.vmem_to_hbm [thread:$0]  %s2811_s18, 2048, %s4447_s4, [#allocation3]  }
 0x2a4   :  { %3546 = dma.done.wait [#allocation3], 2048  }
 0x2a5   :  { %3547 = vsyncadd [#allocation3], 4294965248 }
 0x2a6   :  { %2817 = vsyncpa [#allocation3], 1 }

</bundles_post_ra>
